<compile_context>
chip_gen: v5e
topology: v5e:2x2
jax: 0.10.0
libtpu: 0.0.40
codegen_flags: <defaults>
</compile_context>

<pallas_src>
import functools

import jax
import jax.numpy as jnp
from jax.experimental import pallas as pl
from jax.experimental.pallas import tpu as pltpu

EPS = 1e-3          # self.eps
_STAT_LANES = 128   # lane-dense stats row: [sum g, sum g^2, valid count, 0...]


def _bilinear_matrix(out_size: int, in_size: int) -> jnp.ndarray:
    """Row-interpolation matrix M (out_size, in_size) for align_corners=True."""
    if in_size == 1:
        return jnp.ones((out_size, 1), dtype=jnp.float32)
    if out_size == 1:
        return jnp.zeros((1, in_size), dtype=jnp.float32).at[0, 0].set(1.0)
    src = jnp.arange(out_size, dtype=jnp.float32) * (in_size - 1) / (out_size - 1)
    lo = jnp.clip(jnp.floor(src).astype(jnp.int32), 0, in_size - 2)
    frac = src - lo.astype(jnp.float32)
    rows = jnp.arange(out_size)
    m = jnp.zeros((out_size, in_size), dtype=jnp.float32)
    m = m.at[rows, lo].add(1.0 - frac)
    m = m.at[rows, lo + 1].add(frac)
    return m


def _vmem_capacity_bytes(default: int = 64 << 20) -> int:
    """Trace-time VMEM capacity (falls back to a conservative 64 MiB)."""
    try:
        info = pltpu.get_tpu_info()
        cap = getattr(info, "vmem_capacity_bytes", None)
        if cap:
            return int(cap)
    except Exception:
        pass
    return default


def _choose_row_tile(H: int, W: int, budget_bytes: int) -> int:
    """Largest sublane-aligned row tile whose (TH, W) f32 slab fits the budget."""
    rows = (budget_bytes // (W * 4)) // 8 * 8
    rows = max(8, rows)
    h_round = -(-H // 8) * 8          # round H up to sublane multiple
    return min(rows, h_round)


def _sigloss_kernel(rh_ref, rw_ref, depth_ref, target_ref, out_ref, y_ref,
                    *, H: int, row_tile: int):
    # grid = (B, nR); out_ref is indexed only by b, so it stays resident in
    # VMEM across the row-tile ("arbitrary") axis and acts as an accumulator.
    r = pl.program_id(1)

    @pl.when(r == 0)
    def _init():
        out_ref[...] = jnp.zeros_like(out_ref)
        # Hoisted resize along W: only depends on the batch element, not on r.
        y_ref[...] = jnp.dot(depth_ref[0], rw_ref[...],
                             preferred_element_type=jnp.float32)      # (h, W)

    # Row tile of the precomputed H-direction interpolation matrix.
    start = pl.multiple_of(r * row_tile, row_tile)
    rh_rows = rh_ref[pl.ds(start, row_tile), :]                        # (TH, h)
    pred = jnp.dot(rh_rows, y_ref[...],
                   preferred_element_type=jnp.float32)                 # (TH, W)

    tgt = target_ref[0]                                                # (TH, W)

    # valid_mask = target > 0 (max_depth is None in the default config).
    mask = tgt > 0.0
    if H % row_tile != 0:
        # Boundary tile: rows beyond H hold garbage -> mask them out.
        row_ids = jax.lax.broadcasted_iota(jnp.int32, tgt.shape, 0)
        mask = jnp.logical_and(mask, (r * row_tile + row_ids) < H)

    pred_safe = jnp.where(mask, pred, 1.0)   # avoid log of non-positive garbage
    tgt_safe = jnp.where(mask, tgt, 1.0)
    # g == 0 exactly at masked-out pixels (both operands are log(1 + eps)).
    g = jnp.log(pred_safe + EPS) - jnp.log(tgt_safe + EPS)

    s1 = jnp.sum(g)
    s2 = jnp.sum(g * g)
    cnt = jnp.sum(mask.astype(jnp.float32))

    # Pack the three scalars into a lane-dense vector and accumulate.
    lane = jax.lax.broadcasted_iota(jnp.int32, (1, 1, _STAT_LANES), 2)
    stats = jnp.where(lane == 0, s1,
            jnp.where(lane == 1, s2,
            jnp.where(lane == 2, cnt, 0.0)))
    out_ref[...] += stats


def sig_loss(depth: jnp.ndarray, depth_maps: jnp.ndarray,
             loss_weight: float = 1.0, row_tile: int | None = None):
    """Equivalent of SigLoss.forward()'s loss value.

    depth:      [B, 1, h, w] float32 (NCHW prediction)
    depth_maps: [B, H, W]    float32 (ground truth; unsqueezed to NCHW in torch)
    """
    B, C, h, w = depth.shape
    assert C == 1, "SigLoss expects a single-channel depth prediction"
    _, H, W = depth_maps.shape

    if row_tile is None:
        budget = min(8 << 20, _vmem_capacity_bytes() // 12)
        row_tile = _choose_row_tile(H, W, budget)
    assert row_tile >= 8 and row_tile % 8 == 0, "row_tile must be sublane aligned"

    n_row_tiles = pl.cdiv(H, row_tile)
    h_pad = n_row_tiles * row_tile

    rh = _bilinear_matrix(H, h)               # (H, h)
    if h_pad != H:
        # Zero-pad so in-kernel row slices never go OOB; padded rows give pred=0
        # and are masked out anyway.
        rh = jnp.pad(rh, ((0, h_pad - H), (0, 0)))
    rw = _bilinear_matrix(W, w).T              # (w, W)
    depth2d = depth[:, 0]                      # (B, h, w)

    kernel = functools.partial(_sigloss_kernel, H=H, row_tile=row_tile)

    out = pl.pallas_call(
        kernel,
        out_shape=jax.ShapeDtypeStruct((B, 1, _STAT_LANES), jnp.float32),
        grid_spec=pltpu.PrefetchScalarGridSpec(
            num_scalar_prefetch=0,
            grid=(B, n_row_tiles),
            in_specs=[
                pl.BlockSpec((h_pad, h), lambda b, r: (0, 0)),           # R_h (resident)
                pl.BlockSpec((w, W), lambda b, r: (0, 0)),               # R_w (resident)
                pl.BlockSpec((1, h, w), lambda b, r: (b, 0, 0)),         # depth[b]
                pl.BlockSpec((1, row_tile, W), lambda b, r: (b, r, 0)),  # target rows
            ],
            out_specs=pl.BlockSpec((1, 1, _STAT_LANES), lambda b, r: (b, 0, 0)),
            scratch_shapes=[pltpu.VMEM((h, W), jnp.float32)],            # y = x @ R_w
        ),
        compiler_params=pltpu.CompilerParams(
            dimension_semantics=("parallel", "arbitrary"),
            vmem_limit_bytes=32 * 1024 * 1024),
    )(rh, rw, depth2d, depth_maps)

    S1 = jnp.sum(out[:, 0, 0])
    S2 = jnp.sum(out[:, 0, 1])
    N = jnp.sum(out[:, 0, 2])
    # N <= 1 (no/one valid pixel) gives NaN, matching torch's behavior.
    mean = S1 / N
    var = (S2 - N * mean * mean) / (N - 1.0)   # torch.var default: unbiased (ddof=1)
    Dg = var + 0.15 * mean * mean
    return loss_weight * jnp.sqrt(Dg)


def sig_loss_forward(depth, depth_maps, loss_weight: float = 1.0):
    """Mirrors SigLoss.forward: returns (loss_depth, tb_dict)."""
    # TODO(synk): warm-up branch (self.warm_up_counter mutation) is stateful
    # host-side logic and is disabled by the default config (warm_up=False).
    loss = sig_loss(depth, depth_maps, loss_weight=loss_weight)
    # torch does loss.item() here; we defer the host sync and return the device
    # array (convert lazily when logging).
    tb_dict = {"ddn_loss": loss}
    return loss, tb_dict


def _reference(depth, depth_maps):
    """Pure-JAX (eager) reference of the same math for a sanity check."""
    B, _, h, w = depth.shape
    _, H, W = depth_maps.shape
    rh = _bilinear_matrix(H, h)
    rw = _bilinear_matrix(W, w).T
    pred = jnp.einsum("Hh,bhw,wW->bHW", rh, depth[:, 0], rw)
    mask = depth_maps > 0.0
    g = jnp.log(pred[mask] + EPS) - jnp.log(depth_maps[mask] + EPS)
    Dg = jnp.var(g, ddof=1) + 0.15 * jnp.mean(g) ** 2
    return jnp.sqrt(Dg)


if __name__ == "__main__":
    key = jax.random.PRNGKey(0)
    k1, k2, k3, k4, k5, k6 = jax.random.split(key, 6)

    # --- Case 1: divisible H (multi-tile path + auto-tile path) ---
    B, h, w = 2, 16, 64       # prediction spatial size (downsampled)
    H, W = 32, 128            # ground-truth depth-map spatial size (lane-dense W)

    depth = jax.random.uniform(k1, (B, 1, h, w), jnp.float32, 2.0, 40.0)
    dm = jax.random.uniform(k2, (B, H, W), jnp.float32, 2.0, 46.0)
    drop = jax.random.uniform(k3, (B, H, W)) < 0.3   # some invalid (gt == 0) pixels
    depth_maps = jnp.where(drop, 0.0, dm)

    loss_tiled = sig_loss(depth, depth_maps, row_tile=8)   # exercises accumulation
    loss_auto = sig_loss(depth, depth_maps)                # auto (single) tile
    loss_fwd, tb_dict = sig_loss_forward(depth, depth_maps)
    jax.block_until_ready((loss_tiled, loss_auto, loss_fwd))

    ref = _reference(depth, depth_maps)
    for v in (loss_tiled, loss_auto, loss_fwd):
        assert jnp.isfinite(v), "loss is not finite"
        assert abs(float(v) - float(ref)) < 1e-4, (float(v), float(ref))

    # --- Case 2: H not divisible by the row tile (boundary-mask path) ---
    H2, W2 = 36, 128
    depth2 = jax.random.uniform(k4, (B, 1, h, w), jnp.float32, 2.0, 40.0)
    dm2 = jax.random.uniform(k5, (B, H2, W2), jnp.float32, 2.0, 46.0)
    drop2 = jax.random.uniform(k6, (B, H2, W2)) < 0.3
    depth_maps2 = jnp.where(drop2, 0.0, dm2)

    loss2 = sig_loss(depth2, depth_maps2, row_tile=16)      # 3 tiles, last partial
    jax.block_until_ready(loss2)
    ref2 = _reference(depth2, depth_maps2)
    assert jnp.isfinite(loss2), "loss is not finite"
    assert abs(float(loss2) - float(ref2)) < 1e-4, (float(loss2), float(ref2))

    print("KERNEL_OK")
</pallas_src>

<mosaic_0001>
module attributes {stable_mosaic.version = 11 : i64} {
  func.func @_sigloss_kernel(%arg0: i32, %arg1: i32, %arg2: memref<32x16xf32, #tpu.memory_space<vmem>>, %arg3: memref<64x128xf32, #tpu.memory_space<vmem>>, %arg4: memref<1x16x64xf32, #tpu.memory_space<vmem>>, %arg5: memref<1x8x128xf32, #tpu.memory_space<vmem>>, %arg6: memref<1x1x128xf32, #tpu.memory_space<vmem>>, %arg7: memref<16x128xf32, #tpu.memory_space<vmem>>) attributes {dimension_semantics = [#tpu.dimension_semantics<parallel>, #tpu.dimension_semantics<arbitrary>], iteration_bounds = array<i64: 2, 4>, scalar_prefetch = 0 : i64, scratch_operands = 1 : i64, tpu.core_type = #tpu.core_type<tc>, window_params = [{pipeline_mode = #tpu.pipeline_mode<synchronous>, transform_indices = @transform_0, window_bounds = array<i64: 32, 16>}, {pipeline_mode = #tpu.pipeline_mode<synchronous>, transform_indices = @transform_1, window_bounds = array<i64: 64, 128>}, {transform_indices = @transform_2, window_bounds = array<i64: 1, 16, 64>}, {transform_indices = @transform_3, window_bounds = array<i64: 1, 8, 128>}, {transform_indices = @transform_4, window_bounds = array<i64: 1, 1, 128>}]} {
    %c0_i32 = arith.constant 0 : i32
    %0 = arith.cmpi eq, %arg1, %c0_i32 : i32
    %1 = arith.extui %0 : i1 to i32
    %c0_i32_0 = arith.constant 0 : i32
    %2 = arith.cmpi ne, %1, %c0_i32_0 : i32
    scf.if %2 {
      %cst_22 = arith.constant 0.000000e+00 : f32
      %56 = vector.broadcast %cst_22 : f32 to vector<1x1x128xf32>
      %c0_23 = arith.constant 0 : index
      %c0_24 = arith.constant 0 : index
      %c0_25 = arith.constant 0 : index
      %57 = vector.load %arg6[%c0_23, %c0_24, %c0_25] : memref<1x1x128xf32, #tpu.memory_space<vmem>>, vector<1x1x128xf32>
      tpu.vector_store %arg6[%c0_23, %c0_24, %c0_25], %56 {strides = array<i32>} : memref<1x1x128xf32, #tpu.memory_space<vmem>>, vector<1x1x128xf32>,
      %c0_26 = arith.constant 0 : index
      %c0_27 = arith.constant 0 : index
      %c0_28 = arith.constant 0 : index
      %58 = vector.load %arg4[%c0_26, %c0_27, %c0_28] : memref<1x16x64xf32, #tpu.memory_space<vmem>>, vector<1x16x64xf32>
      %59 = vector.shape_cast %58 : vector<1x16x64xf32> to vector<16x64xf32>
      %c0_29 = arith.constant 0 : index
      %c0_30 = arith.constant 0 : index
      %60 = vector.load %arg3[%c0_29, %c0_30] : memref<64x128xf32, #tpu.memory_space<vmem>>, vector<64x128xf32>
      %cst_31 = arith.constant dense<0.000000e+00> : vector<16x128xf32>
      %61 = tpu.matmul %59, %60, %cst_31 {dimension_numbers = #tpu.dot_dimension_numbers<[1], [0], [0], [1], [0, 0, 1, 1], [], []>} : vector<16x64xf32>, vector<64x128xf32>, vector<16x128xf32> -> vector<16x128xf32>
      %c0_32 = arith.constant 0 : index
      %c0_33 = arith.constant 0 : index
      %62 = vector.load %arg7[%c0_32, %c0_33] : memref<16x128xf32, #tpu.memory_space<vmem>>, vector<16x128xf32>
      tpu.vector_store %arg7[%c0_32, %c0_33], %61 {strides = array<i32>} : memref<16x128xf32, #tpu.memory_space<vmem>>, vector<16x128xf32>,
    } else {
    }
    %c8_i32 = arith.constant 8 : i32
    %3 = arith.muli %arg1, %c8_i32 : i32
    %4 = tpu.assume_multiple %3, 8 : i32
    %5 = arith.index_cast %4 : i32 to index
    %c0 = arith.constant 0 : index
    %6 = vector.load %arg2[%5, %c0] : memref<32x16xf32, #tpu.memory_space<vmem>>, vector<8x16xf32>
    %c0_1 = arith.constant 0 : index
    %c0_2 = arith.constant 0 : index
    %7 = vector.load %arg7[%c0_1, %c0_2] : memref<16x128xf32, #tpu.memory_space<vmem>>, vector<16x128xf32>
    %cst = arith.constant dense<0.000000e+00> : vector<8x128xf32>
    %8 = tpu.matmul %6, %7, %cst {dimension_numbers = #tpu.dot_dimension_numbers<[1], [0], [0], [1], [0, 0, 1, 1], [], []>} : vector<8x16xf32>, vector<16x128xf32>, vector<8x128xf32> -> vector<8x128xf32>
    %c0_3 = arith.constant 0 : index
    %c0_4 = arith.constant 0 : index
    %c0_5 = arith.constant 0 : index
    %9 = vector.load %arg5[%c0_3, %c0_4, %c0_5] : memref<1x8x128xf32, #tpu.memory_space<vmem>>, vector<1x8x128xf32>
    %10 = vector.shape_cast %9 : vector<1x8x128xf32> to vector<8x128xf32>
    %cst_6 = arith.constant 0.000000e+00 : f32
    %11 = vector.broadcast %cst_6 : f32 to vector<8x128xf32>
    %12 = arith.cmpf ogt, %10, %11 : vector<8x128xf32>
    %cst_7 = arith.constant 1.000000e+00 : f32
    %13 = vector.broadcast %cst_7 : f32 to vector<8x128xf32>
    %14 = arith.select %12, %8, %13 : vector<8x128xi1>, vector<8x128xf32>
    %cst_8 = arith.constant 1.000000e+00 : f32
    %15 = vector.broadcast %cst_8 : f32 to vector<8x128xf32>
    %16 = arith.select %12, %10, %15 : vector<8x128xi1>, vector<8x128xf32>
    %cst_9 = arith.constant 1.000000e-03 : f32
    %17 = vector.broadcast %cst_9 : f32 to vector<8x128xf32>
    %18 = arith.addf %14, %17 : vector<8x128xf32>
    %19 = math.log %18 : vector<8x128xf32>
    %cst_10 = arith.constant 1.000000e-03 : f32
    %20 = vector.broadcast %cst_10 : f32 to vector<8x128xf32>
    %21 = arith.addf %16, %20 : vector<8x128xf32>
    %22 = math.log %21 : vector<8x128xf32>
    %23 = arith.subf %19, %22 : vector<8x128xf32>
    %24 = vector.shape_cast %23 : vector<8x128xf32> to vector<1x8x128xf32>
    %cst_11 = arith.constant dense<0.000000e+00> : vector<1xf32>
    %25 = vector.multi_reduction <add>, %24, %cst_11 [1, 2] : vector<1x8x128xf32> to vector<1xf32>
    %26 = vector.shape_cast %25 : vector<1xf32> to vector<1x1x1xf32>
    %27 = vector.extract %26[0, 0, 0] : f32 from vector<1x1x1xf32>
    %28 = arith.mulf %23, %23 : vector<8x128xf32>
    %29 = vector.shape_cast %28 : vector<8x128xf32> to vector<1x8x128xf32>
    %cst_12 = arith.constant dense<0.000000e+00> : vector<1xf32>
    %30 = vector.multi_reduction <add>, %29, %cst_12 [1, 2] : vector<1x8x128xf32> to vector<1xf32>
    %31 = vector.shape_cast %30 : vector<1xf32> to vector<1x1x1xf32>
    %32 = vector.extract %31[0, 0, 0] : f32 from vector<1x1x1xf32>
    %33 = arith.extui %12 : vector<8x128xi1> to vector<8x128xi32>
    %34 = arith.sitofp %33 : vector<8x128xi32> to vector<8x128xf32>
    %35 = vector.shape_cast %34 : vector<8x128xf32> to vector<1x8x128xf32>
    %cst_13 = arith.constant dense<0.000000e+00> : vector<1xf32>
    %36 = vector.multi_reduction <add>, %35, %cst_13 [1, 2] : vector<1x8x128xf32> to vector<1xf32>
    %37 = vector.shape_cast %36 : vector<1xf32> to vector<1x1x1xf32>
    %38 = vector.extract %37[0, 0, 0] : f32 from vector<1x1x1xf32>
    %39 = tpu.iota {dimensions = array<i32: 2>} : vector<1x1x128xi32>
    %c0_i32_14 = arith.constant 0 : i32
    %40 = vector.broadcast %c0_i32_14 : i32 to vector<1x1x128xi32>
    %41 = arith.cmpi eq, %39, %40 : vector<1x1x128xi32>
    %c1_i32 = arith.constant 1 : i32
    %42 = vector.broadcast %c1_i32 : i32 to vector<1x1x128xi32>
    %43 = arith.cmpi eq, %39, %42 : vector<1x1x128xi32>
    %c2_i32 = arith.constant 2 : i32
    %44 = vector.broadcast %c2_i32 : i32 to vector<1x1x128xi32>
    %45 = arith.cmpi eq, %39, %44 : vector<1x1x128xi32>
    %cst_15 = arith.constant 0.000000e+00 : f32
    %46 = vector.broadcast %38 : f32 to vector<1x1x128xf32>
    %47 = vector.broadcast %cst_15 : f32 to vector<1x1x128xf32>
    %48 = arith.select %45, %46, %47 : vector<1x1x128xi1>, vector<1x1x128xf32>
    %49 = vector.broadcast %32 : f32 to vector<1x1x128xf32>
    %50 = arith.select %43, %49, %48 : vector<1x1x128xi1>, vector<1x1x128xf32>
    %51 = vector.broadcast %27 : f32 to vector<1x1x128xf32>
    %52 = arith.select %41, %51, %50 : vector<1x1x128xi1>, vector<1x1x128xf32>
    %c0_16 = arith.constant 0 : index
    %c0_17 = arith.constant 0 : index
    %c0_18 = arith.constant 0 : index
    %53 = vector.load %arg6[%c0_16, %c0_17, %c0_18] : memref<1x1x128xf32, #tpu.memory_space<vmem>>, vector<1x1x128xf32>
    %54 = arith.addf %53, %52 : vector<1x1x128xf32>
    %c0_19 = arith.constant 0 : index
    %c0_20 = arith.constant 0 : index
    %c0_21 = arith.constant 0 : index
    %55 = vector.load %arg6[%c0_19, %c0_20, %c0_21] : memref<1x1x128xf32, #tpu.memory_space<vmem>>, vector<1x1x128xf32>
    tpu.vector_store %arg6[%c0_19, %c0_20, %c0_21], %54 {strides = array<i32>} : memref<1x1x128xf32, #tpu.memory_space<vmem>>, vector<1x1x128xf32>,
    return
  }
  func.func @transform_0(%arg0: i32, %arg1: i32) -> (i32, i32) {
    %c0_i32 = arith.constant 0 : i32
    %c0_i32_0 = arith.constant 0 : i32
    %c0_i32_1 = arith.constant 0 : i32
    return %c0_i32, %c0_i32_0 : i32, i32
  }
  func.func @transform_1(%arg0: i32, %arg1: i32) -> (i32, i32) {
    %c0_i32 = arith.constant 0 : i32
    %c0_i32_0 = arith.constant 0 : i32
    %c0_i32_1 = arith.constant 0 : i32
    return %c0_i32, %c0_i32_0 : i32, i32
  }
  func.func @transform_2(%arg0: i32, %arg1: i32) -> (i32, i32, i32) {
    %c0_i32 = arith.constant 0 : i32
    %c0_i32_0 = arith.constant 0 : i32
    %c0_i32_1 = arith.constant 0 : i32
    return %arg0, %c0_i32, %c0_i32_0 : i32, i32, i32
  }
  func.func @transform_3(%arg0: i32, %arg1: i32) -> (i32, i32, i32) {
    %c0_i32 = arith.constant 0 : i32
    %c0_i32_0 = arith.constant 0 : i32
    return %arg0, %arg1, %c0_i32 : i32, i32, i32
  }
  func.func @transform_4(%arg0: i32, %arg1: i32) -> (i32, i32, i32) {
    %c0_i32 = arith.constant 0 : i32
    %c0_i32_0 = arith.constant 0 : i32
    %c0_i32_1 = arith.constant 0 : i32
    return %arg0, %c0_i32, %c0_i32_0 : i32, i32, i32
  }
}

</mosaic_0001>

<bundles_post_ra>
// kernel: tpu_custom_call.1
= control target key start
LH: loop header
LB: loop body
LE: loop exit
PB: predicated region body
PF: predicated region fallthrough
CT: control target
= control target key end

     0   :  { %s1116_s0 = inlined_call_operand.vmem [shape: f32[32,16], index: 0, kind: input, shape index: {}]   ;;  %s1117_s1 = inlined_call_operand.hbm [shape: f32[64,128], index: 1, kind: input, shape index: {}]   ;;  %s1118_s2 = inlined_call_operand.vmem [shape: f32[2,16,64], index: 2, kind: input, shape index: {}]   ;;  %s1119_s3 = inlined_call_operand.hbm [shape: f32[2,32,128], index: 3, kind: input, shape index: {}]   ;;  %s1120_s4 = inlined_call_operand.hbm [shape: f32[2,1,128], index: 4, kind: output, shape index: {}]  }
   0x1   :  { %1127 = sst [smem:[#allocation18_spill]] %s1117_s1 }
   0x2   :  { %9 = vsyncpa [#allocation4], 0 }
   0x3   :  { %10 = vsyncpa [#allocation7], 0 }
   0x4   :  { %12 = vsyncpa [#allocation7 + $0x1], 0 }
   0x5   :  { %13 = vsyncpa [#allocation5], 0 }
   0x6   :  { %15 = vsyncpa [#allocation5 + $0x1], 0  ;;  %s891_s15 = smov 0   ;;  %s893_s16 = smov 0  }
   0x7   :  { %s895_s17 = smov 0   ;;  %s897_s18 = smov 0  }
   0x8   :  { %s899_s19 = smov 0   ;;  %s901_s20 = smov 0  }
   0x9   :  { %s903_s21 = smov 0   ;;  %s905_s22 = smov 0  }
   0xa   :  { %s907_s23 = smov 0   ;;  %s909_s24 = smov 0  }
   0xb   :  { %s911_s25 = smov 0  }
   0xc LB: > { %1128 = sst [smem:[#allocation12_spill]] %s819_s15  ;;  %s516_s26 = sadd.s32 4294967295, %s859_s25   ;;  %s859_s25 = sphi %s911_s25, %s21_s25   ;;  %s855_s24 = sphi %s909_s24, %s1156_s24   ;;  %s851_s23 = sphi %s907_s23, %s1155_s23   ;;  %s847_s22 = sphi %s905_s22, %s1154_s22   ;;  %s843_s21 = sphi %s903_s21, %s1153_s21   ;;  %s839_s20 = sphi %s901_s20, %s1152_s20   ;;  %s835_s19 = sphi %s899_s19, %s1151_s19   ;;  %s831_s18 = sphi %s897_s18, %s1150_s18   ;;  %s827_s17 = sphi %s895_s17, %s1145_s17   ;;  %s823_s16 = sphi %s893_s16, %s1149_s16   ;;  %s819_s15 = sphi %s891_s15, %s1148_s15  }
   0xd   : > { %1129 = sst [smem:[#allocation13_spill]] %s827_s17  ;;  %p518_p0 = scmp.ge.s32.totalorder %s859_s25, 1 }
   0xe   : > { %p948_p1 = scmp.eq.s32.totalorder %s516_s26, 0  ;;  %p952_p2 = scmp.eq.s32.totalorder %s516_s26, 7 }
   0xf   : > { %p160_p3 = scmp.lt.s32.totalorder %s859_s25, 9  ;;  %s1132_s1 = sld [smem:[#allocation18_spill]] }
  0x10   : > { %s861_s7 = smov [#allocation3]   ;;  %s862_s9 = smov 128  }
  0x11   : > { %p960_p4 = pnand %p518_p0, %p160_p3  ;;  %s176_s8 = sshll.u32 %s861_s7, 4  ;;  %s177_s8 = int_to_ptr.vmem [resolvable:$true] %s176_s8 }
  0x12   : > { %s863_s10 = smov 8   ;;  %s517_s11 = sadd.s32 4294967294, %s859_s25  }
  0x13   : > { %p560_p5 = pneg %p960_p4  ;;  %s30_s12 = sadd.s32 1, %s851_s23 }
  0x14   : > { %p31_p7 = scmp.ge.s32.totalorder %s30_s12, 4  ;;  %s33_s13 = sadd.s32 1, %s855_s24 }
  0x15   : > { %s174_s5 = sshll.u32 %s1132_s1, 4  ;;  %p561_p6 = pnand %p560_p5, %p948_p1  ;;  %s175_s5 = int_to_ptr.hbm [resolvable:$true] %s174_s5 }
  0x16   : > { %s110_s14 = sadd.s32 1, %s839_s20  ;;  %p117_p8 = scmp.ne.s32.totalorder %s839_s20, %s835_s19 }
  0x17   : > { %563 = dma.hbm_to_vmem [thread:$0]  (!%p561_p6), %s175_s5, 1024, %s177_s8, [#allocation4], %s862_s9, %s862_s9, %s863_s10  }
  0x18   : > { %s1158_s12 = smov (%p31_p7, %s30_s12), 0  ;;  %s1160_s13 = smov (!%p31_p7, %s33_s13), %s855_s24 }
  0x19   : > { %1134 = sst [smem:[#allocation14_spill]] %s1158_s12  ;;  %s106_s26 = ssub.s32 %s851_s23, %s1158_s12 }
  0x1a   : > { %p118_p9 = scmp.eq.s32.totalorder %s859_s25, 0  ;;  %p35_p10 = scmp.ge.s32.totalorder %s1160_s13, 2 }
  0x1b   : > { %p123_p11 = scmp.ne.s32.totalorder %s835_s19, %s831_s18  ;;  %s136_s30 = sadd.s32 1, %s827_s17 }
  0x1c   : > { %p982_p12 = por %p118_p9, %p117_p8  ;;  %s1162_s13 = smov (%p35_p10, %s1160_s13), 0 }
  0x1d   : > { %1136 = sst [smem:[#allocation15_spill]] %s1162_s13  ;;  %p991_p13 = por %p948_p1, %p123_p11 }
  0x1e   : > { %p146_p0 = scmp.ne.s32.totalorder %s827_s17, %s823_s16  ;;  %s105_s7 = ssub.s32 %s855_s24, %s1162_s13 }
  0x1f   : > { %p152_p3 = scmp.ne.s32.totalorder %s823_s16, %s819_s15  ;;  %s107_s18 = sor.u32 %s106_s26, %s105_s7 }
  0x20   : > { %p134_p5 = scmp.eq.s32.totalorder %s105_s7, 0  ;;  %p108_p6 = scmp.eq.s32.totalorder %s107_s18, 0 }
  0x21   : > { %p1003_p7 = por %p952_p2, %p146_p0  ;;  %p153_p8 = scmp.eq.s32.totalorder %s517_s11, 7 }
  0x22   : > { %s1008_s9 = scalar_select %p134_p5, %s827_s17, %s136_s30  }
  0x23   : > { %s1138_s8 = scalar_select %p1003_p7, 1, 0 }
  0x24   : > { %1140 = sst [smem:[#allocation17_spill]] %s1008_s9  ;;  %p573_p9 = scmp.lt.s32.totalorder %s859_s25, 8 }
  0x25   : > { %1139 = sst [smem:[#allocation16_spill]] %s1138_s8  ;;  %s198_s1 = sand.u32 1, %s839_s20  }
  0x26   : > { %s1011_s10 = scalar_select %p108_p6, %s839_s20, %s110_s14  }
  0x27   : > { %s522_s12 = sshll.u32 %s855_s24, 2  ;;  %p1016_p10 = por %p153_p8, %p152_p3 }
  0x28   : > { %s521_s26 = sshll.u32 %s198_s1, 3  ;;  %s206_s28 = sadd.s32 %s851_s23, %s522_s12 }
  0x29   : > { %s523_s7 = sshll.u32 %s206_s28, 3  ;;  %s202_s9 = scalar_lea.vmem [#allocation6], %s521_s26 }
  0x2a   : > { %s208_s30 = scalar_lea.hbm %s1119_s3, %s523_s7  ;;  %s212_s17 = sshll.u32 %s202_s9, 4  ;;  %s213_s17 = int_to_ptr.vmem [resolvable:$true] %s212_s17 }
  0x2b   : > { %s210_s8 = sshll.u32 %s208_s30, 4  ;;  %p565_p2 = pnand %p573_p9, %p982_p12  ;;  %s211_s8 = int_to_ptr.hbm [resolvable:$true] %s210_s8 }
  0x2c   : > { %s199_s11 = scalar_lea.sflag [#allocation7], %s198_s1  ;;  %221 = sbr.rel (%p960_p4) target bundleno = 552 (0x228), region = 36 }
  0x2d   : > { %567 = dma.hbm_to_vmem [thread:$0]  (!%p565_p2), %s211_s8, 128, %s213_s17, %s199_s11  }
  0x31   : > { %806 = dma.done.wait (%p948_p1), [#allocation4], 1024  }
  0x32   : > { %808 = vsyncadd (%p948_p1), [#allocation4], 4294966272  ;;  %s228_s15 = sand.u32 1, %s835_s19  }
  0x33   : > { %s1035_s12 = sshll.u32 %s228_s15, 3  ;;  %s229_s14 = scalar_lea.sflag [#allocation7], %s228_s15 }
  0x34   : > { %s232_s29 = scalar_lea.vmem [#allocation6], %s1035_s12 }
  0x35   : > { %810 = dma.done.wait (%p991_p13), %s229_s14, 128  }
  0x36   : > { %812 = vsyncadd (%p991_p13), %s229_s14, 4294967168  ;;  %s260_s1 = sand.u32 1, %s823_s16   ;;  %p262_p4 = scmp.lt.s32.totalorder %s847_s22, 1 }
  0x37   : > { %s1050_s26 = scalar_lea.vmem [#allocation8], %s260_s1  ;;  %p529_p1 = scmp.ne.s32.totalorder %s843_s21, 0 }
  0x38   : > { %s263_s17 = scalar_select %p262_p4, %s847_s22, 1 }
  0x39   : > { %270 = sbr.rel (%p529_p1) target bundleno = 206 (0xce), region = 48 }
  0x3a   : > { %s537_s27 = sshll.u32 %s263_s17, 4 }
  0x3b   : > { %s266_s9 = scalar_lea.vmem %s1118_s2, %s537_s27 }
  0x3e   : > { %v281_v0 = vld [vmem:[#allocation3 + $0x38] sm:$0xff]  ;;  %v280_v1 = vld [vmem:[#allocation3 + $0x30] sm:$0xff]  ;;  %v864_v2 = vmov 0.0   ;;  %v279_v3 = vld [vmem:[#allocation3 + $0x28] sm:$0xff]  ;;  %vm282_vm0 = vcmask 523264  }
  0x3f   : > { %271 = vst [vmem:[%s1050_s26] sm:$0x1] %v864_v2  ;;  %297 = vmatpush.msra.mxu0 %v281_v0  ;;  %538 = vmatpush.msra.mxu1 %v281_v0  ;;  %v278_v4 = vld [vmem:[#allocation3 + $0x20] sm:$0xff]  ;;  %v277_v5 = vld [vmem:[#allocation3 + $0x18] sm:$0xff]  ;;  %v276_v6 = vld [vmem:[#allocation3 + $0x10] sm:$0xff] }
  0x40   : > { %v275_v7 = vld [vmem:[#allocation3 + $0x8] sm:$0xff]  ;;  %v274_v8 = vld [vmem:[#allocation3] sm:$0xff]  ;;  %v272_v9 = vld [vmem:[%s266_s9] sm:$0xff] }
  0x41   : > { %298 = vmatpush.msra.mxu0 %v280_v1  ;;  %539 = vmatpush.msra.mxu1 %v280_v1  ;;  %v273_v10 = vld [vmem:[%s266_s9 + $0x8] sm:$0xff] }
  0x43   : > { %299 = vmatpush.msra.mxu0 %v279_v3  ;;  %540 = vmatpush.msra.mxu1 %v279_v3 }
  0x45   : > { %300 = vmatpush.msra.mxu0 %v278_v4  ;;  %541 = vmatpush.msra.mxu1 %v278_v4 }
  0x47   : > { %301 = vmatpush.msra.mxu0 %v277_v5  ;;  %542 = vmatpush.msra.mxu1 %v277_v5 }
  0x49   : > { %302 = vmatpush.msra.mxu0 %v276_v6  ;;  %543 = vmatpush.msra.mxu1 %v276_v6 }
  0x4b   : > { %303 = vmatpush.msra.mxu0 %v275_v7  ;;  %544 = vmatpush.msra.mxu1 %v275_v7 }
  0x4d   : > { %304 = vmatpush.msra.mxu0 %v274_v8  ;;  %545 = vmatpush.msra.mxu1 %v274_v8 }
  0x4e   : > { %530 = vmatmul.msk.f32.vlgmr.msra.gmra.mxu0 %vm282_vm0, %v272_v9  ;;  %531 = vmatmul.msk.f32.vlgmr.msra.gmra.mxu1 %vm282_vm0, %v273_v10 }
  0xcb   : > { %v306_v11 = vpop.f32.mrf.mxu0  ;;  %v309_v12 = vpop.f32.mrf.mxu1 }
  0xcc   : > { %312 = vst [vmem:[#allocation2] sm:$0xff] %v306_v11 }
  0xcd   : > { %313 = vst [vmem:[#allocation2 + $0x8] sm:$0xff] %v309_v12 }
  0xce PF: > { %s532_s5 = sshll.u32 %s843_s21, 3  ;;  %vm319_vm1 = vcmask 130048   ;;  %v343_v16 = vld [vmem:[%s232_s29] sm:$0xff]  ;;  %v865_v17 = vmov 0.0   ;;  %v384_v51 = vlaneseq  ;;  %s407_s12 = scalar_lea.hbm %s1120_s4, %s847_s22  ;;  %v395_v56 = vld [vmem:[%s1050_s26] sm:$0x1] }
  0xcf   : > { %s315_s18 = scalar_lea.vmem %s1116_s0, %s532_s5  ;;  %vm344_vm2 = vcmp.gt.f32.partialorder %v343_v16, 0.0  ;;  %s409_s17 = sshll.u32 %s1050_s26, 4  ;;  %s410_s17 = int_to_ptr.vmem [resolvable:$true] %s409_s17 }
  0xd0   : > { %v316_v15 = vld [vmem:[%s315_s18] sm:$0xff]  ;;  %v534_v18 = vsel %vm344_vm2, 1.0, %v865_v17  ;;  %v346_v19 = vsel %vm344_vm2, %v343_v16, 1.0  ;;  %v385_v52 = vand.u32 127, %v384_v51  ;;  %s411_s27 = sshll.u32 %s407_s12, 4  ;;  %s399_s22 = scalar_lea.sflag [#allocation5], %s260_s1  ;;  %s412_s27 = int_to_ptr.hbm [resolvable:$true] %s411_s27 }
  0xd1   : > { %375 = vadd.xlane.f32.xlu1 %v534_v18  ;;  %v350_v20 = vadd.f32 0.001, %v346_v19  ;;  %s747_s6 = sshra.s32 %s412_s27, 4  ;;  %s753_s28 = scalar_lea.hbm %s1120_s4, 2  ;;  %s748_s6 = int_to_ptr.hbm [resolvable:$true] %s747_s6 }
  0xd2   : > { %vm388_vm3 = vcmp.eq.s32.totalorder %v385_v52, 2  ;;  %vm387_vm4 = vcmp.eq.s32.totalorder %v385_v52, 1  ;;  %vm386_vm5 = vcmp.eq.s32.totalorder %v385_v52, 0  ;;  %s749_s8 = scalar_lea.hbm %s748_s6, 1  ;;  %p754_p0 = scmp.lt.s32.totalorder %s748_s6, %s1120_s4 }
  0xd3   : > { %v317_v14 = vld [vmem:[#allocation2] sm:$0xff]  ;;  %669 = vlog2.f32 %v350_v20  ;;  %p750_p11 = scmp.ne.s32.totalorder %s748_s6, %s749_s8  ;;  %p755_p3 = scmp.lt.s32.totalorder %s753_s28, %s749_s8 }
  0xd4   : > { %v318_v13 = vld [vmem:[#allocation2 + $0x8] sm:$0xff] }
  0xd5   : > { %337 = vmatpush.msra.mxu0 %v318_v13  ;;  %p751_p12 = pnand %p750_p11, %p1003_p7  ;;  %p756_p5 = por %p755_p3, %p754_p0 }
  0xd7   : > { %338 = vmatpush.msra.mxu0 %v317_v14  ;;  %p752_p13 = pneg %p751_p12 }
  0xd8   : > { %533 = vmatmul.msk.f32.vlgmr.msra.gmra.mxu0 %vm319_vm1, %v316_v15 }
  0xd9   : > { %v670_v24 = vpop.eup %669  ;;  %p757_p6 = pnand %p756_p5, %p752_p13 }
  0xda   : > { %v352_v25 = vmul.f32 0.6931472, %v670_v24 }
 0x144   : > { %v376_v30 = vpop.xlane.xlu1 %375 }
 0x145   : > { %v377_v32 = vrot.slane %v376_v30, 4 }
 0x147   : > { %v378_v35 = vadd.f32 %v377_v32, %v376_v30 }
 0x149   : > { %v379_v38 = vrot.slane %v378_v35, 2 }
 0x14b   : > { %v380_v44 = vadd.f32 %v379_v38, %v378_v35 }
 0x14d   : > { %v381_v47 = vrot.slane %v380_v44, 1 }
 0x14f   : > { %v382_v50 = vadd.f32 %v381_v47, %v380_v44 }
 0x155   : > { %v340_v21 = vpop.f32.mrf.mxu0 }
 0x156   : > { %v345_v22 = vsel %vm344_vm2, %v340_v21, 1.0 }
 0x157   : > { %v347_v23 = vadd.f32 0.001, %v345_v22 }
 0x159   : > { %671 = vlog2.f32 %v347_v23 }
 0x15f   : > { %v672_v26 = vpop.eup %671 }
 0x160   : > { %v349_v27 = vmul.f32 0.6931472, %v672_v26 }
 0x162   : > { %v353_v28 = vsub.f32 %v349_v27, %v352_v25 }
 0x164   : > { %354 = vadd.xlane.f32.xlu0 %v353_v28  ;;  %v363_v29 = vmul.f32 %v353_v28, %v353_v28 }
 0x16c   : > { %364 = vadd.xlane.f32.xlu0 %v363_v29 }
 0x1d7   : > { %v355_v31 = vpop.xlane.xlu0 %354 }
 0x1d8   : > { %v356_v33 = vrot.slane %v355_v31, 4 }
 0x1da   : > { %v357_v34 = vadd.f32 %v356_v33, %v355_v31 }
 0x1dc   : > { %v358_v36 = vrot.slane %v357_v34, 2 }
 0x1de   : > { %v359_v37 = vadd.f32 %v358_v36, %v357_v34 }
 0x1df   : > { %v365_v39 = vpop.xlane.xlu0 %364 }
 0x1e0   : > { %v366_v40 = vrot.slane %v365_v39, 4  ;;  %v360_v41 = vrot.slane %v359_v37, 1 }
 0x1e2   : > { %v367_v42 = vadd.f32 %v366_v40, %v365_v39  ;;  %v361_v43 = vadd.f32 %v360_v41, %v359_v37 }
 0x1e4   : > { %v368_v45 = vrot.slane %v367_v42, 2  ;;  %546 = vpush %v361_v43 }
 0x1e6   : > { %v369_v46 = vadd.f32 %v368_v45, %v367_v42 }
 0x1e8   : > { %v370_v48 = vrot.slane %v369_v46, 1 }
 0x1ea   : > { %v371_v49 = vadd.f32 %v370_v48, %v369_v46 }
 0x1ec   : > { %548 = vpush %v371_v49 }
 0x1ed   : > { %550 = vpush %v382_v50 }
 0x215   : > { %s547_s21 = spop %546 }
 0x216   : > { %v393_v57 = vstv %s547_s21 }
 0x21d   : > { %s549_s30 = spop %548 }
 0x21e   : > { %v391_v53 = vstv %s549_s30  ;;  %s551_s14 = spop %550 }
 0x21f   : > { %v389_v54 = vstv %s551_s14 }
 0x220   : > { %v390_v55 = vsel %vm388_vm3, %v389_v54, 0.0 }
 0x221   : > { %v392_v58 = vsel %vm387_vm4, %v391_v53, %v390_v55 }
 0x222   : > { %v394_v59 = vsel %vm386_vm5, %v393_v57, %v392_v58 }
 0x223   : > { %v396_v60 = vadd.f32 %v395_v56, %v394_v59 }
 0x225   : > { %397 = vst [vmem:[%s1050_s26] sm:$0x1] %v396_v60 }
 0x226   : > { %760 = shalt.err (!%p757_p6)
}
 0x227   : > { %558 = dma.vmem_to_hbm [thread:$0]  (%p1003_p7), %s410_s17, 16, %s412_s27, %s399_s22  }
 0x228 PF: > { %s1143_s1 = sld [smem:[#allocation12_spill]]  ;;  %p575_p8 = scmp.ge.s32.totalorder %s859_s25, 2 }
 0x22a   : > { %p569_p9 = pnand %p575_p8, %p1016_p10 }
 0x22c   : > { %p570_p2 = pneg %p569_p9 }
 0x22e   : > { %s423_s26 = sand.u32 1, %s1143_s1  }
 0x22f   : > { %s424_s21 = scalar_lea.sflag [#allocation5], %s423_s26 }
 0x230   : > { %814 = dma.done.wait (%p570_p2), %s424_s21, 16  }
 0x231   : > { %816 = vsyncadd (%p570_p2), %s424_s21, 4294967280  ;;  %s21_s25 = sadd.s32 1, %s859_s25   ;;  %s1144_s30 = sld [smem:[#allocation13_spill]] }
 0x232   : > { %p18_p4 = scmp.ge.s32.totalorder %s21_s25, 10   ;;  %s1145_s17 = sld [smem:[#allocation17_spill]] }
 0x233   : > { %s1146_s11 = sld [smem:[#allocation14_spill]]  ;;  %s1148_s15 = smov %s823_s16 }
 0x234   : > { %s1147_s12 = sld [smem:[#allocation15_spill]]  ;;  %s1150_s18 = smov %s835_s19 }
 0x235   : > { %s1151_s19 = smov %s839_s20  ;;  %s1152_s20 = smov %s1011_s10 }
 0x236   : > { %s1153_s21 = smov %s851_s23  ;;  %s1154_s22 = smov %s855_s24 }
 0x237   : > { %s1149_s16 = smov %s1144_s30  ;;  %20 = sbr.rel (!%p18_p4) target bundleno = 12 (0xc), region = 94 }
 0x239   : > { %s1155_s23 = smov %s1146_s11 }
 0x23a   : > { %s1156_s24 = smov %s1147_s12 }
 0x23c   :  { %429 = vsyncpa [#allocation4], 1 }
 0x23d   :  { %431 = vsyncpa [#allocation4 + $0x1], 1 }
 0x23e   :  { %432 = vsyncpa [#allocation7], 1 }
 0x23f   :  { %434 = vsyncpa [#allocation7 + $0x1], 1 }
 0x240   :  { %435 = vsyncpa [#allocation5], 1 }
 0x241   :  { %437 = vsyncpa [#allocation5 + $0x1], 1 }

</bundles_post_ra>
